<compile_context>
chip_gen: v7x
topology: tpu7x:2x2x1
jax: 0.10.0
libtpu: 0.0.40
codegen_flags: <defaults>
</compile_context>

<pallas_src>
import functools
import typing

import jax
import jax.numpy as jnp
from jax.experimental import pallas as pl
from jax.experimental.pallas import tpu as pltpu


class EnsembleOutput(typing.NamedTuple):
    """The output of an ensemble model."""
    model_predictions: jax.Array      # mean over ensemble members  [N, C]
    ensemble_predictions: jax.Array   # per-member predictions      [E, N, C]


def _fused_ensemble_kernel(x_ref, wp_ref, b_ref, yall_ref, mean_ref,
                           *, n_members, n_cols, inv_e):
    # One lane-dense MXU matmul covering all E members:
    #   [tn, D](bf16) @ [D, E*C](bf16) -> f32 accumulation on the MXU.
    y = jnp.dot(x_ref[...], wp_ref[...], preferred_element_type=jnp.float32)
    y = y + b_ref[...]                                   # f32 bias, row-broadcast

    # Per-member stores into the [E, tn, C] output block (member axis first, so
    # no wrapper-side transpose), plus the ensemble mean via E unrolled VPU
    # adds (no projector matmul, no [E*C, C] resident identity in VMEM).
    acc = y[:, 0:n_cols]
    yall_ref[0] = acc.astype(yall_ref.dtype)
    for e in range(1, n_members):                        # small static unroll
        ye = y[:, e * n_cols:(e + 1) * n_cols]
        yall_ref[e] = ye.astype(yall_ref.dtype)
        acc = acc + ye
    mean_ref[...] = (acc * inv_e).astype(mean_ref.dtype)


def _vmem_capacity_bytes():
    try:
        return int(pltpu.get_tpu_info().vmem_capacity_bytes)
    except Exception:
        return 64 * 1024 * 1024       # v7x per-TensorCore capacity (most conservative)


def _vmem_footprint_bytes(tn, d, e, c):
    ec = e * c
    x_tile = 2 * tn * d * 2           # bf16 x tile, double-buffered
    y_tile = 2 * e * tn * c * 4       # f32 [E, tn, C] output tile, double-buffered
    m_tile = 2 * tn * c * 4           # f32 mean tile, double-buffered
    w_res = d * ec * 2                # bf16 packed W, single-buffered (Buffered(1))
    b_res = ec * 4                    # f32 packed bias
    live_y = tn * ec * 4              # f32 matmul result live in vregs/VMEM
    return x_tile + y_tile + m_tile + w_res + b_res + live_y


def _pick_batch_tile(n, d, e, c, vmem_budget_bytes):
    """Largest batch tile (multiple of 8) whose working set fits the VMEM budget."""
    if n < 8:
        return n                      # block dim == full array dim is always legal
    tile = 8
    for cand in (512, 384, 256, 192, 128, 64, 32, 16, 8):
        if cand > n:
            continue
        if _vmem_footprint_bytes(cand, d, e, c) <= vmem_budget_bytes:
            tile = cand
            break
    # If even tn=8 does not fit (huge D*E*C), the next step would be a second
    # grid axis tiling the packed-column (E*C) dimension instead of keeping W
    # fully resident; not needed at these sizes.
    #
    # v7x megacore: ensure the "parallel" batch axis has >= 2 grid steps
    # whenever N allows, so both TensorCores get work.
    if n >= 16 and tile >= n:
        tile = max(8, ((n // 2) // 8) * 8)
    return tile


def sklearn_mean_ensemble_forward(x, w, b):
    """x: [N, D], w: [E, D, C], b: [E, C] -> EnsembleOutput([N,C], [E,N,C])."""
    N, D = x.shape
    E, _, C = w.shape
    EC = E * C
    out_dtype = jnp.float32

    # bf16 MXU operands (f32 operands lower to slow multi-pass emulation);
    # accumulation stays f32 via preferred_element_type.
    x_bf = x.astype(jnp.bfloat16)
    w_packed = jnp.transpose(w, (1, 0, 2)).reshape(D, EC).astype(jnp.bfloat16)
    b_packed = b.reshape(1, EC).astype(jnp.float32)

    vmem_physical = _vmem_capacity_bytes()
    tn = _pick_batch_tile(N, D, E, C, int(0.6 * vmem_physical))
    fp = _vmem_footprint_bytes(tn, D, E, C)
    vmem_limit = int(min(0.9 * vmem_physical, max(32 << 20, 2 * fp + (8 << 20))))
    grid = (pl.cdiv(N, tn),)

    flops = 2 * N * D * EC + E * N * C
    bytes_accessed = (N * D * 2          # x (bf16)
                      + D * EC * 2       # packed W (bf16)
                      + EC * 4           # packed bias (f32)
                      + E * N * C * 4    # ensemble_predictions (f32)
                      + N * C * 4)       # mean (f32)

    def _build(resident_kwargs):
        return pl.pallas_call(
            functools.partial(_fused_ensemble_kernel,
                              n_members=E, n_cols=C, inv_e=1.0 / float(E)),
            out_shape=(jax.ShapeDtypeStruct((E, N, C), out_dtype),
                       jax.ShapeDtypeStruct((N, C), out_dtype)),
            grid_spec=pltpu.PrefetchScalarGridSpec(
                num_scalar_prefetch=0,
                grid=grid,
                in_specs=[
                    pl.BlockSpec((tn, D), lambda i: (i, 0)),                   # x batch tile
                    pl.BlockSpec((D, EC), lambda i: (0, 0), **resident_kwargs),  # resident W
                    pl.BlockSpec((1, EC), lambda i: (0, 0), **resident_kwargs),  # resident bias
                ],
                out_specs=[
                    pl.BlockSpec((E, tn, C), lambda i: (0, i, 0)),  # [E, N, C] directly
                    pl.BlockSpec((tn, C), lambda i: (i, 0)),        # mean [N, C]
                ],
            ),
            compiler_params=pltpu.CompilerParams(
                dimension_semantics=("parallel",),      # batch axis -> megacore
                vmem_limit_bytes=vmem_limit,            # v5e default scope is only 16 MiB
            ),
            cost_estimate=pl.CostEstimate(flops=flops, transcendentals=0,
                                          bytes_accessed=bytes_accessed),
        )

    try:
        # Grid-invariant operands: single-buffer them (halves their VMEM
        # footprint; matters for v7x's 64 MiB and v5e's scoped limit).
        yall, mean = _build({"pipeline_mode": pl.Buffered(1)})(x_bf, w_packed, b_packed)
    except Exception:
        # Fallback for Pallas builds that reject Buffered(1): default buffering.
        yall, mean = _build({})(x_bf, w_packed, b_packed)

    # No wrapper-side transpose/reshape: outputs are already in final layout.
    return EnsembleOutput(model_predictions=mean, ensemble_predictions=yall)


if __name__ == "__main__":
    key = jax.random.PRNGKey(0)
    kx, kw, kb = jax.random.split(key, 3)

    E, N, D, C = 4, 8, 32, 16   # ensemble members, batch, features, classes
    x = jax.random.normal(kx, (N, D), dtype=jnp.float32)
    w = jax.random.normal(kw, (E, D, C), dtype=jnp.float32) * 0.1
    b = jax.random.normal(kb, (E, C), dtype=jnp.float32) * 0.1

    out = sklearn_mean_ensemble_forward(x, w, b)
    jax.block_until_ready(out.model_predictions)
    jax.block_until_ready(out.ensemble_predictions)

    # Reference in plain JAX with the same bf16 operand rounding (tight check),
    # plus a loose check against the pure-f32 reference.
    xb = x.astype(jnp.bfloat16).astype(jnp.float32)
    wb = w.astype(jnp.bfloat16).astype(jnp.float32)
    y_ref = jnp.einsum("nd,edc->enc", xb, wb) + b[:, None, :]
    mean_ref = jnp.mean(y_ref, axis=0)
    y_ref_f32 = jnp.einsum("nd,edc->enc", x, w) + b[:, None, :]

    assert out.ensemble_predictions.shape == (E, N, C)
    assert out.model_predictions.shape == (N, C)
    assert jnp.allclose(out.ensemble_predictions, y_ref, atol=1e-3, rtol=1e-3)
    assert jnp.allclose(out.model_predictions, mean_ref, atol=1e-3, rtol=1e-3)
    assert jnp.allclose(out.ensemble_predictions, y_ref_f32, atol=5e-2)

    print("KERNEL_OK")
</pallas_src>

<mosaic_0001>
module attributes {stable_mosaic.version = 11 : i64} {
  func.func @_fused_ensemble_kernel(%arg0: i32, %arg1: memref<8x32xbf16, #tpu.memory_space<vmem>>, %arg2: memref<32x64xbf16, #tpu.memory_space<vmem>>, %arg3: memref<1x64xf32, #tpu.memory_space<vmem>>, %arg4: memref<4x8x16xf32, #tpu.memory_space<vmem>>, %arg5: memref<8x16xf32, #tpu.memory_space<vmem>>) attributes {dimension_semantics = [#tpu.dimension_semantics<parallel>], iteration_bounds = array<i64: 1>, scalar_prefetch = 0 : i64, scratch_operands = 0 : i64, tpu.core_type = #tpu.core_type<tc>, window_params = [{transform_indices = @transform_0, window_bounds = array<i64: 8, 32>}, {pipeline_mode = #tpu.pipeline_mode<synchronous>, transform_indices = @transform_1, window_bounds = array<i64: 32, 64>}, {pipeline_mode = #tpu.pipeline_mode<synchronous>, transform_indices = @transform_2, window_bounds = array<i64: 1, 64>}, {transform_indices = @transform_3, window_bounds = array<i64: 4, 8, 16>}, {transform_indices = @transform_4, window_bounds = array<i64: 8, 16>}]} {
    %c0 = arith.constant 0 : index
    %c0_0 = arith.constant 0 : index
    %0 = vector.load %arg1[%c0, %c0_0] : memref<8x32xbf16, #tpu.memory_space<vmem>>, vector<8x32xbf16>
    %c0_1 = arith.constant 0 : index
    %c0_2 = arith.constant 0 : index
    %1 = vector.load %arg2[%c0_1, %c0_2] : memref<32x64xbf16, #tpu.memory_space<vmem>>, vector<32x64xbf16>
    %cst = arith.constant dense<0.000000e+00> : vector<8x64xf32>
    %2 = tpu.matmul %0, %1, %cst {dimension_numbers = #tpu.dot_dimension_numbers<[1], [0], [0], [1], [0, 0, 1, 1], [], []>} : vector<8x32xbf16>, vector<32x64xbf16>, vector<8x64xf32> -> vector<8x64xf32>
    %c0_3 = arith.constant 0 : index
    %c0_4 = arith.constant 0 : index
    %3 = vector.load %arg3[%c0_3, %c0_4] : memref<1x64xf32, #tpu.memory_space<vmem>>, vector<1x64xf32>
    %4 = vector.broadcast %3 : vector<1x64xf32> to vector<8x64xf32>
    %5 = arith.addf %2, %4 : vector<8x64xf32>
    %6 = vector.extract_strided_slice %5 {offsets = [0, 0], sizes = [8, 16], strides = [1, 1]} : vector<8x64xf32> to vector<8x16xf32>
    %c0_5 = arith.constant 0 : index
    %c0_6 = arith.constant 0 : index
    %c0_7 = arith.constant 0 : index
    %7 = vector.load %arg4[%c0_5, %c0_6, %c0_7] : memref<4x8x16xf32, #tpu.memory_space<vmem>>, vector<1x8x16xf32>
    %8 = vector.shape_cast %7 : vector<1x8x16xf32> to vector<8x16xf32>
    %9 = vector.shape_cast %6 : vector<8x16xf32> to vector<1x8x16xf32>
    tpu.vector_store %arg4[%c0_5, %c0_6, %c0_7], %9 {strides = array<i32>} : memref<4x8x16xf32, #tpu.memory_space<vmem>>, vector<1x8x16xf32>,
    %10 = vector.extract_strided_slice %5 {offsets = [0, 16], sizes = [8, 16], strides = [1, 1]} : vector<8x64xf32> to vector<8x16xf32>
    %c1 = arith.constant 1 : index
    %c0_8 = arith.constant 0 : index
    %c0_9 = arith.constant 0 : index
    %11 = vector.load %arg4[%c1, %c0_8, %c0_9] : memref<4x8x16xf32, #tpu.memory_space<vmem>>, vector<1x8x16xf32>
    %12 = vector.shape_cast %11 : vector<1x8x16xf32> to vector<8x16xf32>
    %13 = vector.shape_cast %10 : vector<8x16xf32> to vector<1x8x16xf32>
    tpu.vector_store %arg4[%c1, %c0_8, %c0_9], %13 {strides = array<i32>} : memref<4x8x16xf32, #tpu.memory_space<vmem>>, vector<1x8x16xf32>,
    %14 = arith.addf %6, %10 : vector<8x16xf32>
    %15 = vector.extract_strided_slice %5 {offsets = [0, 32], sizes = [8, 16], strides = [1, 1]} : vector<8x64xf32> to vector<8x16xf32>
    %c2 = arith.constant 2 : index
    %c0_10 = arith.constant 0 : index
    %c0_11 = arith.constant 0 : index
    %16 = vector.load %arg4[%c2, %c0_10, %c0_11] : memref<4x8x16xf32, #tpu.memory_space<vmem>>, vector<1x8x16xf32>
    %17 = vector.shape_cast %16 : vector<1x8x16xf32> to vector<8x16xf32>
    %18 = vector.shape_cast %15 : vector<8x16xf32> to vector<1x8x16xf32>
    tpu.vector_store %arg4[%c2, %c0_10, %c0_11], %18 {strides = array<i32>} : memref<4x8x16xf32, #tpu.memory_space<vmem>>, vector<1x8x16xf32>,
    %19 = arith.addf %14, %15 : vector<8x16xf32>
    %20 = vector.extract_strided_slice %5 {offsets = [0, 48], sizes = [8, 16], strides = [1, 1]} : vector<8x64xf32> to vector<8x16xf32>
    %c3 = arith.constant 3 : index
    %c0_12 = arith.constant 0 : index
    %c0_13 = arith.constant 0 : index
    %21 = vector.load %arg4[%c3, %c0_12, %c0_13] : memref<4x8x16xf32, #tpu.memory_space<vmem>>, vector<1x8x16xf32>
    %22 = vector.shape_cast %21 : vector<1x8x16xf32> to vector<8x16xf32>
    %23 = vector.shape_cast %20 : vector<8x16xf32> to vector<1x8x16xf32>
    tpu.vector_store %arg4[%c3, %c0_12, %c0_13], %23 {strides = array<i32>} : memref<4x8x16xf32, #tpu.memory_space<vmem>>, vector<1x8x16xf32>,
    %24 = arith.addf %19, %20 : vector<8x16xf32>
    %cst_14 = arith.constant 2.500000e-01 : f32
    %25 = vector.broadcast %cst_14 : f32 to vector<8x16xf32>
    %26 = arith.mulf %24, %25 : vector<8x16xf32>
    %c0_15 = arith.constant 0 : index
    %c0_16 = arith.constant 0 : index
    %27 = vector.load %arg5[%c0_15, %c0_16] : memref<8x16xf32, #tpu.memory_space<vmem>>, vector<8x16xf32>
    tpu.vector_store %arg5[%c0_15, %c0_16], %26 {strides = array<i32>} : memref<8x16xf32, #tpu.memory_space<vmem>>, vector<8x16xf32>,
    return
  }
  func.func @transform_0(%arg0: i32) -> (i32, i32) {
    %c0_i32 = arith.constant 0 : i32
    %c0_i32_0 = arith.constant 0 : i32
    return %arg0, %c0_i32 : i32, i32
  }
  func.func @transform_1(%arg0: i32) -> (i32, i32) {
    %c0_i32 = arith.constant 0 : i32
    %c0_i32_0 = arith.constant 0 : i32
    %c0_i32_1 = arith.constant 0 : i32
    return %c0_i32, %c0_i32_0 : i32, i32
  }
  func.func @transform_2(%arg0: i32) -> (i32, i32) {
    %c0_i32 = arith.constant 0 : i32
    %c0_i32_0 = arith.constant 0 : i32
    %c0_i32_1 = arith.constant 0 : i32
    return %c0_i32, %c0_i32_0 : i32, i32
  }
  func.func @transform_3(%arg0: i32) -> (i32, i32, i32) {
    %c0_i32 = arith.constant 0 : i32
    %c0_i32_0 = arith.constant 0 : i32
    %c0_i32_1 = arith.constant 0 : i32
    return %c0_i32, %arg0, %c0_i32_0 : i32, i32, i32
  }
  func.func @transform_4(%arg0: i32) -> (i32, i32) {
    %c0_i32 = arith.constant 0 : i32
    %c0_i32_0 = arith.constant 0 : i32
    return %arg0, %c0_i32 : i32, i32
  }
}

module attributes {stable_mosaic.version = 11 : i64} {
  func.func @_fused_ensemble_kernel(%arg0: i32, %arg1: memref<8x32xbf16, #tpu.memory_space<vmem>>, %arg2: memref<32x64xbf16, #tpu.memory_space<vmem>>, %arg3: memref<1x64xf32, #tpu.memory_space<vmem>>, %arg4: memref<4x8x16xf32, #tpu.memory_space<vmem>>, %arg5: memref<8x16xf32, #tpu.memory_space<vmem>>) attributes {dimension_semantics = [#tpu.dimension_semantics<parallel>], iteration_bounds = array<i64: 1>, scalar_prefetch = 0 : i64, scratch_operands = 0 : i64, tpu.core_type = #tpu.core_type<tc>, window_params = [{transform_indices = @transform_0, window_bounds = array<i64: 8, 32>}, {pipeline_mode = #tpu.pipeline_mode<synchronous>, transform_indices = @transform_1, window_bounds = array<i64: 32, 64>}, {pipeline_mode = #tpu.pipeline_mode<synchronous>, transform_indices = @transform_2, window_bounds = array<i64: 1, 64>}, {transform_indices = @transform_3, window_bounds = array<i64: 4, 8, 16>}, {transform_indices = @transform_4, window_bounds = array<i64: 8, 16>}]} {
    %c0 = arith.constant 0 : index
    %c0_0 = arith.constant 0 : index
    %0 = vector.load %arg1[%c0, %c0_0] : memref<8x32xbf16, #tpu.memory_space<vmem>>, vector<8x32xbf16>
    %c0_1 = arith.constant 0 : index
    %c0_2 = arith.constant 0 : index
    %1 = vector.load %arg2[%c0_1, %c0_2] : memref<32x64xbf16, #tpu.memory_space<vmem>>, vector<32x64xbf16>
    %cst = arith.constant dense<0.000000e+00> : vector<8x64xf32>
    %2 = tpu.matmul %0, %1, %cst {dimension_numbers = #tpu.dot_dimension_numbers<[1], [0], [0], [1], [0, 0, 1, 1], [], []>} : vector<8x32xbf16>, vector<32x64xbf16>, vector<8x64xf32> -> vector<8x64xf32>
    %c0_3 = arith.constant 0 : index
    %c0_4 = arith.constant 0 : index
    %3 = vector.load %arg3[%c0_3, %c0_4] : memref<1x64xf32, #tpu.memory_space<vmem>>, vector<1x64xf32>
    %4 = vector.broadcast %3 : vector<1x64xf32> to vector<8x64xf32>
    %5 = arith.addf %2, %4 : vector<8x64xf32>
    %6 = vector.extract_strided_slice %5 {offsets = [0, 0], sizes = [8, 16], strides = [1, 1]} : vector<8x64xf32> to vector<8x16xf32>
    %c0_5 = arith.constant 0 : index
    %c0_6 = arith.constant 0 : index
    %c0_7 = arith.constant 0 : index
    %7 = vector.load %arg4[%c0_5, %c0_6, %c0_7] : memref<4x8x16xf32, #tpu.memory_space<vmem>>, vector<1x8x16xf32>
    %8 = vector.shape_cast %7 : vector<1x8x16xf32> to vector<8x16xf32>
    %9 = vector.shape_cast %6 : vector<8x16xf32> to vector<1x8x16xf32>
    tpu.vector_store %arg4[%c0_5, %c0_6, %c0_7], %9 {strides = array<i32>} : memref<4x8x16xf32, #tpu.memory_space<vmem>>, vector<1x8x16xf32>,
    %10 = vector.extract_strided_slice %5 {offsets = [0, 16], sizes = [8, 16], strides = [1, 1]} : vector<8x64xf32> to vector<8x16xf32>
    %c1 = arith.constant 1 : index
    %c0_8 = arith.constant 0 : index
    %c0_9 = arith.constant 0 : index
    %11 = vector.load %arg4[%c1, %c0_8, %c0_9] : memref<4x8x16xf32, #tpu.memory_space<vmem>>, vector<1x8x16xf32>
    %12 = vector.shape_cast %11 : vector<1x8x16xf32> to vector<8x16xf32>
    %13 = vector.shape_cast %10 : vector<8x16xf32> to vector<1x8x16xf32>
    tpu.vector_store %arg4[%c1, %c0_8, %c0_9], %13 {strides = array<i32>} : memref<4x8x16xf32, #tpu.memory_space<vmem>>, vector<1x8x16xf32>,
    %14 = arith.addf %6, %10 : vector<8x16xf32>
    %15 = vector.extract_strided_slice %5 {offsets = [0, 32], sizes = [8, 16], strides = [1, 1]} : vector<8x64xf32> to vector<8x16xf32>
    %c2 = arith.constant 2 : index
    %c0_10 = arith.constant 0 : index
    %c0_11 = arith.constant 0 : index
    %16 = vector.load %arg4[%c2, %c0_10, %c0_11] : memref<4x8x16xf32, #tpu.memory_space<vmem>>, vector<1x8x16xf32>
    %17 = vector.shape_cast %16 : vector<1x8x16xf32> to vector<8x16xf32>
    %18 = vector.shape_cast %15 : vector<8x16xf32> to vector<1x8x16xf32>
    tpu.vector_store %arg4[%c2, %c0_10, %c0_11], %18 {strides = array<i32>} : memref<4x8x16xf32, #tpu.memory_space<vmem>>, vector<1x8x16xf32>,
    %19 = arith.addf %14, %15 : vector<8x16xf32>
    %20 = vector.extract_strided_slice %5 {offsets = [0, 48], sizes = [8, 16], strides = [1, 1]} : vector<8x64xf32> to vector<8x16xf32>
    %c3 = arith.constant 3 : index
    %c0_12 = arith.constant 0 : index
    %c0_13 = arith.constant 0 : index
    %21 = vector.load %arg4[%c3, %c0_12, %c0_13] : memref<4x8x16xf32, #tpu.memory_space<vmem>>, vector<1x8x16xf32>
    %22 = vector.shape_cast %21 : vector<1x8x16xf32> to vector<8x16xf32>
    %23 = vector.shape_cast %20 : vector<8x16xf32> to vector<1x8x16xf32>
    tpu.vector_store %arg4[%c3, %c0_12, %c0_13], %23 {strides = array<i32>} : memref<4x8x16xf32, #tpu.memory_space<vmem>>, vector<1x8x16xf32>,
    %24 = arith.addf %19, %20 : vector<8x16xf32>
    %cst_14 = arith.constant 2.500000e-01 : f32
    %25 = vector.broadcast %cst_14 : f32 to vector<8x16xf32>
    %26 = arith.mulf %24, %25 : vector<8x16xf32>
    %c0_15 = arith.constant 0 : index
    %c0_16 = arith.constant 0 : index
    %27 = vector.load %arg5[%c0_15, %c0_16] : memref<8x16xf32, #tpu.memory_space<vmem>>, vector<8x16xf32>
    tpu.vector_store %arg5[%c0_15, %c0_16], %26 {strides = array<i32>} : memref<8x16xf32, #tpu.memory_space<vmem>>, vector<8x16xf32>,
    return
  }
  func.func @transform_0(%arg0: i32) -> (i32, i32) {
    %c0_i32 = arith.constant 0 : i32
    %c0_i32_0 = arith.constant 0 : i32
    return %arg0, %c0_i32 : i32, i32
  }
  func.func @transform_1(%arg0: i32) -> (i32, i32) {
    %c0_i32 = arith.constant 0 : i32
    %c0_i32_0 = arith.constant 0 : i32
    %c0_i32_1 = arith.constant 0 : i32
    return %c0_i32, %c0_i32_0 : i32, i32
  }
  func.func @transform_2(%arg0: i32) -> (i32, i32) {
    %c0_i32 = arith.constant 0 : i32
    %c0_i32_0 = arith.constant 0 : i32
    %c0_i32_1 = arith.constant 0 : i32
    return %c0_i32, %c0_i32_0 : i32, i32
  }
  func.func @transform_3(%arg0: i32) -> (i32, i32, i32) {
    %c0_i32 = arith.constant 0 : i32
    %c0_i32_0 = arith.constant 0 : i32
    %c0_i32_1 = arith.constant 0 : i32
    return %c0_i32, %arg0, %c0_i32_0 : i32, i32, i32
  }
  func.func @transform_4(%arg0: i32) -> (i32, i32) {
    %c0_i32 = arith.constant 0 : i32
    %c0_i32_0 = arith.constant 0 : i32
    return %arg0, %c0_i32 : i32, i32
  }
}

</mosaic_0001>

<bundles_post_ra>
// kernel: tpu_custom_call.1
= control target key start
LH: loop header
LB: loop body
LE: loop exit
PB: predicated region body
PF: predicated region fallthrough
CT: control target
= control target key end

     0   :  { %10 = vsyncpa [#allocation3], 0  ;;  %s395_s0 = inlined_call_operand.hbm [shape: bf16[8,32], index: 0, kind: input, shape index: {}]   ;;  %s396_s1 = inlined_call_operand.hbm [shape: bf16[32,64], index: 1, kind: input, shape index: {}]   ;;  %s397_s2 = inlined_call_operand.vmem [shape: f32[1,64], index: 2, kind: input, shape index: {}]   ;;  %s398_s3 = inlined_call_operand.hbm [shape: f32[4,8,16], index: 3, kind: output, shape index: {0}]   ;;  %s399_s4 = inlined_call_operand.hbm [shape: f32[8,16], index: 4, kind: output, shape index: {1}]  }
   0x1   :  { %11 = vsyncpa [#allocation6], 0 }
   0x2   :  { %12 = vsyncpa [#allocation4], 0 }
   0x3   :  { %13 = vsyncpa [#allocation9], 0  ;;  %s294_s15 = smov [#allocation2]   ;;  %s295_s17 = smov [#allocation5]  }
   0x4   :  { %s20_s16 = sshll.u32 %s294_s15, 4  ;;  %s29_s18 = sshll.u32 %s295_s17, 4  ;;  %s21_s16 = int_to_ptr.vmem [resolvable:$true] %s20_s16  ;;  %s332_s18 = int_to_ptr.vmem [resolvable:$true] %s29_s18 }
   0x5   :  { %s198_s21 = scalar_lea.hbm %s395_s0, 64 }
   0x6   :  { %p199_p0 = scmp.ne.s32.totalorder %s395_s0, %s198_s21  ;;  %p202_p1 = scmp.lt.u32.totalorder %s198_s21, %s395_s0 }
   0x8   :  { %p204_p2 = pnand %p202_p1, %p199_p0 }
   0xa   :  { %207 = shalt.err (!%p204_p2)
}
   0xb   :  { %s208_s26 = scalar_lea.vmem %s21_s16, 64  ;;  %p213_p4 = scmp.lt.s32.totalorder %s21_s16, %s21_s16 }
   0xc   :  { %p209_p3 = scmp.ne.s32.totalorder %s21_s16, %s208_s26  ;;  %p214_p5 = scmp.lt.s32.totalorder %s208_s26, %s208_s26 }
   0xe   :  { %p215_p6 = por %p214_p5, %p213_p4 }
  0x10   :  { %p216_p7 = pnand %p215_p6, %p209_p3 }
  0x12   :  { %219 = shalt.err (!%p216_p7)
}
  0x13   :  { %23 = dma.hbm_to_vmem [thread:$0]  %s395_s0, 64, %s21_s16, [#allocation3]  }
  0x14   :  { %s220_s5 = scalar_lea.hbm %s396_s1, 256 }
  0x15   :  { %p221_p8 = scmp.ne.s32.totalorder %s396_s1, %s220_s5  ;;  %p224_p9 = scmp.lt.u32.totalorder %s220_s5, %s396_s1 }
  0x17   :  { %p226_p10 = pnand %p224_p9, %p221_p8 }
  0x19   :  { %229 = shalt.err (!%p226_p10)
}
  0x1a   :  { %s230_s10 = scalar_lea.vmem %s332_s18, 256  ;;  %p235_p12 = scmp.lt.s32.totalorder %s332_s18, %s332_s18 }
  0x1b   :  { %p231_p11 = scmp.ne.s32.totalorder %s332_s18, %s230_s10  ;;  %p236_p13 = scmp.lt.s32.totalorder %s230_s10, %s230_s10 }
  0x1d   :  { %p237_p0 = por %p236_p13, %p235_p12 }
  0x1f   :  { %p238_p1 = pnand %p237_p0, %p231_p11 }
  0x21   :  { %241 = shalt.err (!%p238_p1)
}
  0x22   :  { %s296_s0 = smov 64   ;;  %s297_s11 = smov 4  }
  0x23   :  { %35 = dma.hbm_to_vmem [thread:$0]  %s396_s1, 256, %s332_s18, [#allocation6], %s296_s0, %s296_s0, %s297_s11  }
  0x24   :  { %286 = dma.done.wait [#allocation3], 64  }
  0x25   :  { %287 = vsyncadd [#allocation3], 4294967232 }
  0x26   :  { %288 = dma.done.wait [#allocation6], 256  }
  0x27   :  { %289 = vsyncadd [#allocation6], 4294967040  ;;  %v298_v0 = vmov 0.0   ;;  %vm299_vm0 = vmmov 0   ;;  %v196_v1 = vld [vmem:[#allocation5] sm:$0xff]   ;;  %v197_v2 = vld [vmem:[#allocation5 + $0x8] sm:$0xff]  }
  0x28   :  { %175 = vmatprep.subr.bf16.mxu0 %v298_v0  ;;  %179 = vmatprep.mubr.msk.bf16.mxu0 %vm299_vm0, %v298_v0  ;;  %v45_v3 = vld [vmem:[#allocation2] sm:$0xf]  ;;  %vm69_vm1 = vcmask 261120   ;;  %vm113_vm2 = vcmask 130048   ;;  %s300_s1 = smov 80   ;;  %s301_s16 = smov 112  }
  0x29   :  { %176 = vmatpush3.bf16.msra.mxu0 %v196_v1  ;;  %v168_v4 = vld [vmem:[%s397_s2] ss:$0 sm:$0xff]  ;;  %s302_s17 = smov 96   ;;  %s303_s18 = smov [#allocation7]  }
  0x2a   :  { %177 = vmatprep.subr.bf16.mxu0 %v298_v0  ;;  %s141_s19 = sshll.u32 %s303_s18, 4  ;;  %s304_s2 = smov [#allocation8]   ;;  %s142_s19 = int_to_ptr.vmem [resolvable:$true] %s141_s19 }
  0x2b   :  { %s154_s20 = sshll.u32 %s304_s2, 4  ;;  %s242_s21 = scalar_lea.vmem %s142_s19, 512  ;;  %s155_s20 = int_to_ptr.vmem [resolvable:$true] %s154_s20 }
  0x2c   :  { %p243_p2 = scmp.ne.s32.totalorder %s142_s19, %s242_s21  ;;  %p247_p3 = scmp.lt.s32.totalorder %s142_s19, %s142_s19 }
  0x2d   :  { %178 = vmatpush3.bf16.msra.mxu0 %v197_v2  ;;  %p248_p4 = scmp.lt.s32.totalorder %s242_s21, %s242_s21 }
  0x2f   :  { %p249_p5 = por %p248_p4, %p247_p3 }
  0x30   :  { %180 = vmatmul.mubr.msk.bf16.vlgmr.msra.gmra.mrb[0].mxu0 %vm69_vm1, %v45_v3 }
  0x31   :  { %p250_p6 = pnand %p249_p5, %p243_p2 }
 0x103   :  { %v107_v5 = vpop.f32.mrb[0].mxu0 }
 0x104   :  { %v108_v6 = vadd.f32 %v168_v4, %v107_v5  ;;  %v181_v7 = vpop.f32.mrb[1].mxu0 }
 0x105   :  { %v110_v8 = vpop.f32.mrb[2].mxu0 }
 0x106   :  { %128 = vrot.lane.b32.xlu1 %v108_v6, %s300_s1  ;;  %116 = vrot.lane.b32.xlu0 %v108_v6, %s301_s16  ;;  %v182_v9 = vpop.f32.mrb[3].mxu0  ;;  %114 = vst.msk [vmem:[#allocation7] sm:$0xff] %vm113_vm2, %v108_v6 }
 0x10a   :  { %122 = vrot.lane.b32.xlu0 %v108_v6, %s302_s17 }
 0x178   :  { %v129_v10 = vpop.permute.xlu1 %128  ;;  %v117_v11 = vpop.permute.xlu0 %116 }
 0x179   :  { %132 = vst.msk [vmem:[#allocation7 + $0x18] sm:$0xff] %vm113_vm2, %v129_v10  ;;  %120 = vst.msk [vmem:[#allocation7 + $0x8] sm:$0xff] %vm113_vm2, %v117_v11  ;;  %v121_v12 = vadd.f32 %v117_v11, %v108_v6 }
 0x17c   :  { %v123_v13 = vpop.permute.xlu0 %122 }
 0x17d   :  { %126 = vst.msk [vmem:[#allocation7 + $0x10] sm:$0xff] %vm113_vm2, %v123_v13  ;;  %v127_v14 = vadd.f32 %v123_v13, %v121_v12 }
 0x17e   :  { %253 = shalt.err (!%p250_p6)
}
 0x17f   :  { %s254_s24 = scalar_lea.hbm %s398_s3, 512 }
 0x180   :  { %p255_p7 = scmp.ne.s32.totalorder %s398_s3, %s254_s24  ;;  %p258_p8 = scmp.lt.u32.totalorder %s254_s24, %s398_s3 }
 0x182   :  { %p260_p9 = pnand %p258_p8, %p255_p7 }
 0x184   :  { %263 = shalt.err (!%p260_p9)
}
 0x185   :  { %s305_s29 = smov 128   ;;  %s306_s30 = smov 8   ;;  %v133_v15 = vadd.f32 %v129_v10, %v127_v14 }
 0x186   :  { %147 = dma.vmem_to_hbm [thread:$0]  %s142_s19, 512, %s398_s3, [#allocation4], %s305_s29, %s305_s29, %s306_s30  }
 0x187   :  { %v134_v16 = vmul.f32 0.25, %v133_v15  ;;  %s264_s7 = scalar_lea.vmem %s155_s20, 128  ;;  %p269_p11 = scmp.lt.s32.totalorder %s155_s20, %s155_s20 }
 0x188   :  { %p265_p10 = scmp.ne.s32.totalorder %s155_s20, %s264_s7  ;;  %p270_p12 = scmp.lt.s32.totalorder %s264_s7, %s264_s7 }
 0x189   :  { %135 = vst.msk [vmem:[#allocation8] sm:$0xff] %vm113_vm2, %v134_v16 }
 0x18a   :  { %p271_p13 = por %p270_p12, %p269_p11 }
 0x18c   :  { %p272_p0 = pnand %p271_p13, %p265_p10 }
 0x18e   :  { %275 = shalt.err (!%p272_p0)
}
 0x18f   :  { %s276_s10 = scalar_lea.hbm %s399_s4, 128 }
 0x190   :  { %p277_p1 = scmp.ne.s32.totalorder %s399_s4, %s276_s10  ;;  %p280_p2 = scmp.lt.u32.totalorder %s276_s10, %s399_s4 }
 0x192   :  { %p282_p3 = pnand %p280_p2, %p277_p1 }
 0x194   :  { %285 = shalt.err (!%p282_p3)
}
 0x195   :  { %157 = dma.vmem_to_hbm [thread:$0]  %s155_s20, 128, %s399_s4, [#allocation9]  }
 0x196   :  { %290 = dma.done.wait [#allocation4], 512  }
 0x197   :  { %291 = vsyncadd [#allocation4], 4294966784 }
 0x198   :  { %292 = dma.done.wait [#allocation9], 128  }
 0x199   :  { %293 = vsyncadd [#allocation9], 4294967168 }
 0x19a   :  { %164 = vsyncpa [#allocation3], 1 }
 0x19b   :  { %165 = vsyncpa [#allocation6], 1 }
 0x19c   :  { %166 = vsyncpa [#allocation4], 1 }
 0x19d   :  { %167 = vsyncpa [#allocation9], 1 }

// kernel: tpu_custom_call.1
= control target key start
LH: loop header
LB: loop body
LE: loop exit
PB: predicated region body
PF: predicated region fallthrough
CT: control target
= control target key end

     0   :  { %10 = vsyncpa [#allocation3], 0  ;;  %s395_s0 = inlined_call_operand.hbm [shape: bf16[8,32], index: 0, kind: input, shape index: {}]   ;;  %s396_s1 = inlined_call_operand.hbm [shape: bf16[32,64], index: 1, kind: input, shape index: {}]   ;;  %s397_s2 = inlined_call_operand.vmem [shape: f32[1,64], index: 2, kind: input, shape index: {}]   ;;  %s398_s3 = inlined_call_operand.hbm [shape: f32[4,8,16], index: 3, kind: output, shape index: {0}]   ;;  %s399_s4 = inlined_call_operand.hbm [shape: f32[8,16], index: 4, kind: output, shape index: {1}]  }
   0x1   :  { %11 = vsyncpa [#allocation6], 0 }
   0x2   :  { %12 = vsyncpa [#allocation4], 0 }
   0x3   :  { %13 = vsyncpa [#allocation9], 0  ;;  %s294_s15 = smov [#allocation2]   ;;  %s295_s17 = smov [#allocation5]  }
   0x4   :  { %s20_s16 = sshll.u32 %s294_s15, 4  ;;  %s29_s18 = sshll.u32 %s295_s17, 4  ;;  %s21_s16 = int_to_ptr.vmem [resolvable:$true] %s20_s16  ;;  %s332_s18 = int_to_ptr.vmem [resolvable:$true] %s29_s18 }
   0x5   :  { %s198_s21 = scalar_lea.hbm %s395_s0, 64 }
   0x6   :  { %p199_p0 = scmp.ne.s32.totalorder %s395_s0, %s198_s21  ;;  %p202_p1 = scmp.lt.u32.totalorder %s198_s21, %s395_s0 }
   0x8   :  { %p204_p2 = pnand %p202_p1, %p199_p0 }
   0xa   :  { %207 = shalt.err (!%p204_p2)
}
   0xb   :  { %s208_s26 = scalar_lea.vmem %s21_s16, 64  ;;  %p213_p4 = scmp.lt.s32.totalorder %s21_s16, %s21_s16 }
   0xc   :  { %p209_p3 = scmp.ne.s32.totalorder %s21_s16, %s208_s26  ;;  %p214_p5 = scmp.lt.s32.totalorder %s208_s26, %s208_s26 }
   0xe   :  { %p215_p6 = por %p214_p5, %p213_p4 }
  0x10   :  { %p216_p7 = pnand %p215_p6, %p209_p3 }
  0x12   :  { %219 = shalt.err (!%p216_p7)
}
  0x13   :  { %23 = dma.hbm_to_vmem [thread:$0]  %s395_s0, 64, %s21_s16, [#allocation3]  }
  0x14   :  { %s220_s5 = scalar_lea.hbm %s396_s1, 256 }
  0x15   :  { %p221_p8 = scmp.ne.s32.totalorder %s396_s1, %s220_s5  ;;  %p224_p9 = scmp.lt.u32.totalorder %s220_s5, %s396_s1 }
  0x17   :  { %p226_p10 = pnand %p224_p9, %p221_p8 }
  0x19   :  { %229 = shalt.err (!%p226_p10)
}
  0x1a   :  { %s230_s10 = scalar_lea.vmem %s332_s18, 256  ;;  %p235_p12 = scmp.lt.s32.totalorder %s332_s18, %s332_s18 }
  0x1b   :  { %p231_p11 = scmp.ne.s32.totalorder %s332_s18, %s230_s10  ;;  %p236_p13 = scmp.lt.s32.totalorder %s230_s10, %s230_s10 }
  0x1d   :  { %p237_p0 = por %p236_p13, %p235_p12 }
  0x1f   :  { %p238_p1 = pnand %p237_p0, %p231_p11 }
  0x21   :  { %241 = shalt.err (!%p238_p1)
}
  0x22   :  { %s296_s0 = smov 64   ;;  %s297_s11 = smov 4  }
  0x23   :  { %35 = dma.hbm_to_vmem [thread:$0]  %s396_s1, 256, %s332_s18, [#allocation6], %s296_s0, %s296_s0, %s297_s11  }
  0x24   :  { %286 = dma.done.wait [#allocation3], 64  }
  0x25   :  { %287 = vsyncadd [#allocation3], 4294967232 }
  0x26   :  { %288 = dma.done.wait [#allocation6], 256  }
  0x27   :  { %289 = vsyncadd [#allocation6], 4294967040  ;;  %v298_v0 = vmov 0.0   ;;  %vm299_vm0 = vmmov 0   ;;  %v196_v1 = vld [vmem:[#allocation5] sm:$0xff]   ;;  %v197_v2 = vld [vmem:[#allocation5 + $0x8] sm:$0xff]  }
  0x28   :  { %175 = vmatprep.subr.bf16.mxu0 %v298_v0  ;;  %179 = vmatprep.mubr.msk.bf16.mxu0 %vm299_vm0, %v298_v0  ;;  %v45_v3 = vld [vmem:[#allocation2] sm:$0xf]  ;;  %vm69_vm1 = vcmask 261120   ;;  %vm113_vm2 = vcmask 130048   ;;  %s300_s1 = smov 80   ;;  %s301_s16 = smov 112  }
  0x29   :  { %176 = vmatpush3.bf16.msra.mxu0 %v196_v1  ;;  %v168_v4 = vld [vmem:[%s397_s2] ss:$0 sm:$0xff]  ;;  %s302_s17 = smov 96   ;;  %s303_s18 = smov [#allocation7]  }
  0x2a   :  { %177 = vmatprep.subr.bf16.mxu0 %v298_v0  ;;  %s141_s19 = sshll.u32 %s303_s18, 4  ;;  %s304_s2 = smov [#allocation8]   ;;  %s142_s19 = int_to_ptr.vmem [resolvable:$true] %s141_s19 }
  0x2b   :  { %s154_s20 = sshll.u32 %s304_s2, 4  ;;  %s242_s21 = scalar_lea.vmem %s142_s19, 512  ;;  %s155_s20 = int_to_ptr.vmem [resolvable:$true] %s154_s20 }
  0x2c   :  { %p243_p2 = scmp.ne.s32.totalorder %s142_s19, %s242_s21  ;;  %p247_p3 = scmp.lt.s32.totalorder %s142_s19, %s142_s19 }
  0x2d   :  { %178 = vmatpush3.bf16.msra.mxu0 %v197_v2  ;;  %p248_p4 = scmp.lt.s32.totalorder %s242_s21, %s242_s21 }
  0x2f   :  { %p249_p5 = por %p248_p4, %p247_p3 }
  0x30   :  { %180 = vmatmul.mubr.msk.bf16.vlgmr.msra.gmra.mrb[0].mxu0 %vm69_vm1, %v45_v3 }
  0x31   :  { %p250_p6 = pnand %p249_p5, %p243_p2 }
 0x103   :  { %v107_v5 = vpop.f32.mrb[0].mxu0 }
 0x104   :  { %v108_v6 = vadd.f32 %v168_v4, %v107_v5  ;;  %v181_v7 = vpop.f32.mrb[1].mxu0 }
 0x105   :  { %v110_v8 = vpop.f32.mrb[2].mxu0 }
 0x106   :  { %128 = vrot.lane.b32.xlu1 %v108_v6, %s300_s1  ;;  %116 = vrot.lane.b32.xlu0 %v108_v6, %s301_s16  ;;  %v182_v9 = vpop.f32.mrb[3].mxu0  ;;  %114 = vst.msk [vmem:[#allocation7] sm:$0xff] %vm113_vm2, %v108_v6 }
 0x10a   :  { %122 = vrot.lane.b32.xlu0 %v108_v6, %s302_s17 }
 0x178   :  { %v129_v10 = vpop.permute.xlu1 %128  ;;  %v117_v11 = vpop.permute.xlu0 %116 }
 0x179   :  { %132 = vst.msk [vmem:[#allocation7 + $0x18] sm:$0xff] %vm113_vm2, %v129_v10  ;;  %120 = vst.msk [vmem:[#allocation7 + $0x8] sm:$0xff] %vm113_vm2, %v117_v11  ;;  %v121_v12 = vadd.f32 %v117_v11, %v108_v6 }
 0x17c   :  { %v123_v13 = vpop.permute.xlu0 %122 }
 0x17d   :  { %126 = vst.msk [vmem:[#allocation7 + $0x10] sm:$0xff] %vm113_vm2, %v123_v13  ;;  %v127_v14 = vadd.f32 %v123_v13, %v121_v12 }
 0x17e   :  { %253 = shalt.err (!%p250_p6)
}
 0x17f   :  { %s254_s24 = scalar_lea.hbm %s398_s3, 512 }
 0x180   :  { %p255_p7 = scmp.ne.s32.totalorder %s398_s3, %s254_s24  ;;  %p258_p8 = scmp.lt.u32.totalorder %s254_s24, %s398_s3 }
 0x182   :  { %p260_p9 = pnand %p258_p8, %p255_p7 }
 0x184   :  { %263 = shalt.err (!%p260_p9)
}
 0x185   :  { %s305_s29 = smov 128   ;;  %s306_s30 = smov 8   ;;  %v133_v15 = vadd.f32 %v129_v10, %v127_v14 }
 0x186   :  { %147 = dma.vmem_to_hbm [thread:$0]  %s142_s19, 512, %s398_s3, [#allocation4], %s305_s29, %s305_s29, %s306_s30  }
 0x187   :  { %v134_v16 = vmul.f32 0.25, %v133_v15  ;;  %s264_s7 = scalar_lea.vmem %s155_s20, 128  ;;  %p269_p11 = scmp.lt.s32.totalorder %s155_s20, %s155_s20 }
 0x188   :  { %p265_p10 = scmp.ne.s32.totalorder %s155_s20, %s264_s7  ;;  %p270_p12 = scmp.lt.s32.totalorder %s264_s7, %s264_s7 }
 0x189   :  { %135 = vst.msk [vmem:[#allocation8] sm:$0xff] %vm113_vm2, %v134_v16 }
 0x18a   :  { %p271_p13 = por %p270_p12, %p269_p11 }
 0x18c   :  { %p272_p0 = pnand %p271_p13, %p265_p10 }
 0x18e   :  { %275 = shalt.err (!%p272_p0)
}
 0x18f   :  { %s276_s10 = scalar_lea.hbm %s399_s4, 128 }
 0x190   :  { %p277_p1 = scmp.ne.s32.totalorder %s399_s4, %s276_s10  ;;  %p280_p2 = scmp.lt.u32.totalorder %s276_s10, %s399_s4 }
 0x192   :  { %p282_p3 = pnand %p280_p2, %p277_p1 }
 0x194   :  { %285 = shalt.err (!%p282_p3)
}
 0x195   :  { %157 = dma.vmem_to_hbm [thread:$0]  %s155_s20, 128, %s399_s4, [#allocation9]  }
 0x196   :  { %290 = dma.done.wait [#allocation4], 512  }
 0x197   :  { %291 = vsyncadd [#allocation4], 4294966784 }
 0x198   :  { %292 = dma.done.wait [#allocation9], 128  }
 0x199   :  { %293 = vsyncadd [#allocation9], 4294967168 }
 0x19a   :  { %164 = vsyncpa [#allocation3], 1 }
 0x19b   :  { %165 = vsyncpa [#allocation6], 1 }
 0x19c   :  { %166 = vsyncpa [#allocation4], 1 }
 0x19d   :  { %167 = vsyncpa [#allocation9], 1 }

</bundles_post_ra>
